<compile_context>
chip_gen: v7x
topology: tpu7x:2x2x1
jax: 0.10.0
libtpu: 0.0.40
codegen_flags: <defaults>
</compile_context>

<pallas_src>
import jax
import jax.numpy as jnp
from jax.experimental import pallas as pl
from jax.experimental.pallas import tpu as pltpu


def _add_kernel(a_ref, b_ref, o_ref):
    o_ref[...] = a_ref[...] + b_ref[...]


def _sublane_pack(ebytes: int) -> int:
    """Rows per packed sublane group (8 for f32, 16 for bf16, 32 for int8)."""
    if ebytes in (1, 2, 4):
        return 8 * (4 // ebytes)
    return 8  # conservative for unusual itemsizes


def _pick_cols(total: int, ebytes: int, max_cols: int = 4096):
    """Pick a lane width `cols` (multiple of 128 dividing `total`).

    Among all candidates, prefer the factorization whose row count wastes the
    fewest padded sublane rows; tie-break toward the widest cols.  Returns
    None if `total` has no multiple-of-128 divisor <= max_cols.
    """
    pack = _sublane_pack(ebytes)
    best = None  # (sublane_utilization, cols)
    c = 128
    while c <= min(max_cols, total):
        if total % c == 0:
            rows = total // c
            padded_rows = -(-rows // pack) * pack
            key = (rows / padded_rows, c)
            if best is None or key > best:
                best = key
        c += 128
    return None if best is None else best[1]


def pallas_add(a: jax.Array, b: jax.Array) -> jax.Array:
    assert a.shape == b.shape and a.dtype == b.dtype
    orig_shape = a.shape
    dtype = a.dtype
    total = int(a.size)
    ebytes = jnp.dtype(dtype).itemsize
    bytes_per_operand = total * ebytes

    cost = pl.CostEstimate(
        flops=total, transcendentals=0, bytes_accessed=3 * bytes_per_operand
    )

    cols = _pick_cols(total, ebytes)

    # ---- small problems: one whole-array block, no grid, no per-step tax ----
    SMALL_LIMIT = 1 << 20  # 1 MiB per operand; 3 operands stay well inside VMEM
    if bytes_per_operand <= SMALL_LIMIT:
        if cols is not None:
            rows = total // cols
            out2 = pl.pallas_call(
                _add_kernel,
                out_shape=jax.ShapeDtypeStruct((rows, cols), dtype),
                cost_estimate=cost,
            )(a.reshape(rows, cols), b.reshape(rows, cols))
            return out2.reshape(orig_shape)
        # No lane-dense factorization: whole-array block on the original shape
        # (block == full array dims waives the (8,128) rule).
        return pl.pallas_call(
            _add_kernel,
            out_shape=jax.ShapeDtypeStruct(orig_shape, dtype),
            cost_estimate=cost,
        )(a, b)

    # ---- large problems: stream big lane-dense blocks through VMEM ----
    pack = _sublane_pack(ebytes)
    TARGET_BLOCK_BYTES = 4 << 20  # per operand per grid step

    if cols is not None:
        rows = total // cols
        tile_rows = max(pack, TARGET_BLOCK_BYTES // (cols * ebytes))
        tile_rows = (tile_rows // pack) * pack
        tile_rows = min(tile_rows, rows)
        block_bytes = tile_rows * cols * ebytes
        grid = (pl.cdiv(rows, tile_rows),)
        spec = pl.BlockSpec((tile_rows, cols), lambda i: (i, 0))
        out_shape2 = (rows, cols)
        args = (a.reshape(rows, cols), b.reshape(rows, cols))
    else:
        # Element count not a multiple of 128: flatten to 1-D and stream blocks
        # that are a multiple of 1024 packed elements (8x128 f32); only the
        # single tail block gets masked stores.
        unit = 1024 * max(1, 4 // ebytes)
        blk = min(TARGET_BLOCK_BYTES // ebytes, total)
        blk = max(unit, (blk // unit) * unit)
        block_bytes = blk * ebytes
        grid = (pl.cdiv(total, blk),)
        spec = pl.BlockSpec((blk,), lambda i: (i,))
        out_shape2 = (total,)
        args = (a.reshape(total), b.reshape(total))

    # 3 operands x 2 pipeline buffers x block, plus margin; capped so it stays
    # comfortably under v7x's 64 MiB physical VMEM while clearing the v5e
    # (16 MiB) / v6e (32 MiB) scoped defaults.
    vmem_limit = min(48 << 20, max(32 << 20, 3 * 2 * block_bytes + (8 << 20)))

    out2 = pl.pallas_call(
        _add_kernel,
        out_shape=jax.ShapeDtypeStruct(out_shape2, dtype),
        grid=grid,
        in_specs=[spec, spec],
        out_specs=spec,
        compiler_params=pltpu.CompilerParams(
            dimension_semantics=("parallel",),
            vmem_limit_bytes=vmem_limit,
        ),
        cost_estimate=cost,
    )(*args)
    return out2.reshape(orig_shape)


if __name__ == "__main__":
    key = jax.random.PRNGKey(0)
    k1, k2, k3, k4 = jax.random.split(key, 4)

    # Spec shape (small path: single lane-dense whole-array block).
    x89 = jax.random.normal(k1, (1, 320, 14, 14), dtype=jnp.float32)
    x103 = jax.random.normal(k2, (1, 320, 14, 14), dtype=jnp.float32)
    y = pallas_add(x89, x103)
    jax.block_until_ready(y)
    expected = x89 + x103
    assert y.shape == expected.shape
    assert jnp.allclose(y, expected, atol=1e-6), "mismatch vs reference add (small path)"

    # Larger input to exercise the gridded streaming path (multi-step grid,
    # explicit vmem_limit_bytes, megacore-parallel axis).
    a_big = jax.random.normal(k3, (1, 128, 128, 128), dtype=jnp.float32)
    b_big = jax.random.normal(k4, (1, 128, 128, 128), dtype=jnp.float32)
    y_big = pallas_add(a_big, b_big)
    jax.block_until_ready(y_big)
    assert jnp.allclose(y_big, a_big + b_big, atol=1e-6), "mismatch vs reference add (large path)"

    print("KERNEL_OK")
</pallas_src>

<mosaic_0001>
module attributes {stable_mosaic.version = 11 : i64} {
  func.func @_add_kernel(%arg0: memref<245x256xf32, #tpu.memory_space<vmem>>, %arg1: memref<245x256xf32, #tpu.memory_space<vmem>>, %arg2: memref<245x256xf32, #tpu.memory_space<vmem>>) attributes {dimension_semantics = [], scalar_prefetch = 0 : i64, scratch_operands = 0 : i64, tpu.core_type = #tpu.core_type<tc>} {
    %c0 = arith.constant 0 : index
    %c0_0 = arith.constant 0 : index
    %0 = vector.load %arg0[%c0, %c0_0] : memref<245x256xf32, #tpu.memory_space<vmem>>, vector<245x256xf32>
    %c0_1 = arith.constant 0 : index
    %c0_2 = arith.constant 0 : index
    %1 = vector.load %arg1[%c0_1, %c0_2] : memref<245x256xf32, #tpu.memory_space<vmem>>, vector<245x256xf32>
    %2 = arith.addf %0, %1 : vector<245x256xf32>
    %c0_3 = arith.constant 0 : index
    %c0_4 = arith.constant 0 : index
    %3 = vector.load %arg2[%c0_3, %c0_4] : memref<245x256xf32, #tpu.memory_space<vmem>>, vector<245x256xf32>
    tpu.vector_store %arg2[%c0_3, %c0_4], %2 {strides = array<i32>} : memref<245x256xf32, #tpu.memory_space<vmem>>, vector<245x256xf32>,
    return
  }
}

</mosaic_0001>

<bundles_post_ra>
// kernel: tpu_custom_call.1
= control target key start
LH: loop header
LB: loop body
LE: loop exit
PB: predicated region body
PF: predicated region fallthrough
CT: control target
= control target key end

     0   :  { %7 = vsyncpa [#allocation3], 0  ;;  %s448_s0 = inlined_call_operand.hbm [shape: f32[245,256], index: 0, kind: input, shape index: {}]   ;;  %s449_s1 = inlined_call_operand.hbm [shape: f32[245,256], index: 1, kind: input, shape index: {}]   ;;  %s450_s2 = inlined_call_operand.hbm [shape: f32[245,256], index: 2, kind: output, shape index: {}]  }
   0x1   :  { %8 = vsyncpa [#allocation6], 0 }
   0x2   :  { %9 = vsyncpa [#allocation4], 0  ;;  %s383_s9 = smov [#allocation2]   ;;  %s311_s13 = scalar_lea.hbm %s448_s0, 7936 }
   0x3   :  { %s15_s10 = sshll.u32 %s383_s9, 4  ;;  %p312_p0 = scmp.ne.s32.totalorder %s448_s0, %s311_s13  ;;  %s16_s10 = int_to_ptr.vmem [resolvable:$true] %s15_s10 }
   0x4   :  { %p315_p1 = scmp.lt.u32.totalorder %s311_s13, %s448_s0 }
   0x6   :  { %p317_p2 = pnand %p315_p1, %p312_p0 }
   0x8   :  { %320 = shalt.err (!%p317_p2)
}
   0x9   :  { %s321_s18 = scalar_lea.vmem %s16_s10, 7936  ;;  %p326_p4 = scmp.lt.s32.totalorder %s16_s10, %s16_s10 }
   0xa   :  { %p322_p3 = scmp.ne.s32.totalorder %s16_s10, %s321_s18  ;;  %p327_p5 = scmp.lt.s32.totalorder %s321_s18, %s321_s18 }
   0xc   :  { %p328_p6 = por %p327_p5, %p326_p4 }
   0xe   :  { %p329_p7 = pnand %p328_p6, %p322_p3 }
  0x10   :  { %332 = shalt.err (!%p329_p7)
}
  0x11   :  { %s384_s19 = smov 256   ;;  %s385_s20 = smov 16  }
  0x12   :  { %21 = dma.hbm_to_vmem [thread:$0]  %s448_s0, 7936, %s16_s10, [#allocation3], %s384_s19, %s384_s19, %s385_s20  }
  0x13   :  { %s386_s23 = smov [#allocation5]   ;;  %s333_s27 = scalar_lea.hbm %s449_s1, 7936 }
  0x14   :  { %s27_s24 = sshll.u32 %s386_s23, 4  ;;  %p334_p8 = scmp.ne.s32.totalorder %s449_s1, %s333_s27  ;;  %s28_s24 = int_to_ptr.vmem [resolvable:$true] %s27_s24 }
  0x15   :  { %p337_p9 = scmp.lt.u32.totalorder %s333_s27, %s449_s1 }
  0x17   :  { %p339_p10 = pnand %p337_p9, %p334_p8 }
  0x19   :  { %342 = shalt.err (!%p339_p10)
}
  0x1a   :  { %s343_s4 = scalar_lea.vmem %s28_s24, 7936  ;;  %p348_p12 = scmp.lt.s32.totalorder %s28_s24, %s28_s24 }
  0x1b   :  { %p344_p11 = scmp.ne.s32.totalorder %s28_s24, %s343_s4  ;;  %p349_p13 = scmp.lt.s32.totalorder %s343_s4, %s343_s4 }
  0x1d   :  { %p350_p0 = por %p349_p13, %p348_p12 }
  0x1f   :  { %p351_p1 = pnand %p350_p0, %p344_p11 }
  0x21   :  { %354 = shalt.err (!%p351_p1)
}
  0x22   :  { %33 = dma.hbm_to_vmem [thread:$0]  %s449_s1, 7936, %s28_s24, [#allocation6], %s384_s19, %s384_s19, %s385_s20  }
  0x23   :  { %377 = dma.done.wait [#allocation3], 7936  }
  0x24   :  { %378 = vsyncadd [#allocation3], 4294959360 }
  0x25   :  { %379 = dma.done.wait [#allocation6], 7936  }
  0x26   :  { %380 = vsyncadd [#allocation6], 4294959360  ;;  %v40_v0 = vld [vmem:[#allocation2] sm:$0xff]  ;;  %v102_v1 = vld [vmem:[#allocation5] sm:$0xff]  ;;  %s387_s1 = smov [#allocation7]  }
  0x27   :  { %v41_v2 = vld [vmem:[#allocation2 + $0x8] sm:$0xff]  ;;  %v164_v3 = vadd.f32 %v102_v1, %v40_v0  ;;  %v103_v4 = vld [vmem:[#allocation5 + $0x8] sm:$0xff]  ;;  %v42_v5 = vld [vmem:[#allocation2 + $0x10] sm:$0xff]  ;;  %s293_s6 = sshll.u32 %s387_s1, 4  ;;  %s294_s6 = int_to_ptr.vmem [resolvable:$true] %s293_s6 }
  0x28   :  { %v104_v6 = vld [vmem:[#allocation5 + $0x10] sm:$0xff]  ;;  %v165_v7 = vadd.f32 %v103_v4, %v41_v2  ;;  %v43_v9 = vld [vmem:[#allocation2 + $0x18] sm:$0xff]  ;;  %v105_v10 = vld [vmem:[#allocation5 + $0x18] sm:$0xff]  ;;  %s355_s7 = scalar_lea.vmem %s294_s6, 7936  ;;  %p360_p3 = scmp.lt.s32.totalorder %s294_s6, %s294_s6 }
  0x29   :  { %v166_v8 = vadd.f32 %v104_v6, %v42_v5  ;;  %v44_v11 = vld [vmem:[#allocation2 + $0x20] sm:$0xff]  ;;  %226 = vst [vmem:[#allocation7] sm:$0xff] %v164_v3  ;;  %v167_v12 = vadd.f32 %v105_v10, %v43_v9  ;;  %v106_v13 = vld [vmem:[#allocation5 + $0x20] sm:$0xff]  ;;  %v45_v14 = vld [vmem:[#allocation2 + $0x28] sm:$0xff]  ;;  %p356_p2 = scmp.ne.s32.totalorder %s294_s6, %s355_s7  ;;  %p361_p4 = scmp.lt.s32.totalorder %s355_s7, %s355_s7 }
  0x2a   :  { %v107_v15 = vld [vmem:[#allocation5 + $0x28] sm:$0xff]  ;;  %227 = vst [vmem:[#allocation7 + $0x8] sm:$0xff] %v165_v7  ;;  %v168_v16 = vadd.f32 %v106_v13, %v44_v11  ;;  %v46_v18 = vld [vmem:[#allocation2 + $0x30] sm:$0xff]  ;;  %v108_v19 = vld [vmem:[#allocation5 + $0x30] sm:$0xff] }
  0x2b   :  { %228 = vst [vmem:[#allocation7 + $0x10] sm:$0xff] %v166_v8  ;;  %v169_v17 = vadd.f32 %v107_v15, %v45_v14  ;;  %v47_v20 = vld [vmem:[#allocation2 + $0x38] sm:$0xff]  ;;  %229 = vst [vmem:[#allocation7 + $0x18] sm:$0xff] %v167_v12  ;;  %v170_v21 = vadd.f32 %v108_v19, %v46_v18  ;;  %v109_v22 = vld [vmem:[#allocation5 + $0x38] sm:$0xff]  ;;  %p362_p5 = por %p361_p4, %p360_p3 }
  0x2c   :  { %v48_v23 = vld [vmem:[#allocation2 + $0x40] sm:$0xff]  ;;  %v110_v24 = vld [vmem:[#allocation5 + $0x40] sm:$0xff]  ;;  %230 = vst [vmem:[#allocation7 + $0x20] sm:$0xff] %v168_v16  ;;  %v171_v25 = vadd.f32 %v109_v22, %v47_v20  ;;  %v49_v27 = vld [vmem:[#allocation2 + $0x48] sm:$0xff] }
  0x2d   :  { %231 = vst [vmem:[#allocation7 + $0x28] sm:$0xff] %v169_v17  ;;  %v172_v26 = vadd.f32 %v110_v24, %v48_v23  ;;  %v111_v28 = vld [vmem:[#allocation5 + $0x48] sm:$0xff]  ;;  %v50_v29 = vld [vmem:[#allocation2 + $0x50] sm:$0xff]  ;;  %232 = vst [vmem:[#allocation7 + $0x30] sm:$0xff] %v170_v21  ;;  %p363_p6 = pnand %p362_p5, %p356_p2 }
  0x2e   :  { %v173_v30 = vadd.f32 %v111_v28, %v49_v27  ;;  %v112_v31 = vld [vmem:[#allocation5 + $0x50] sm:$0xff]  ;;  %v51_v32 = vld [vmem:[#allocation2 + $0x58] sm:$0xff]  ;;  %v113_v33 = vld [vmem:[#allocation5 + $0x58] sm:$0xff]  ;;  %233 = vst [vmem:[#allocation7 + $0x38] sm:$0xff] %v171_v25 }
  0x2f   :  { %234 = vst [vmem:[#allocation7 + $0x40] sm:$0xff] %v172_v26  ;;  %v174_v34 = vadd.f32 %v112_v31, %v50_v29  ;;  %v175_v35 = vadd.f32 %v113_v33, %v51_v32  ;;  %v52_v36 = vld [vmem:[#allocation2 + $0x60] sm:$0xff]  ;;  %v114_v37 = vld [vmem:[#allocation5 + $0x60] sm:$0xff]  ;;  %v53_v38 = vld [vmem:[#allocation2 + $0x68] sm:$0xff] }
  0x30   :  { %235 = vst [vmem:[#allocation7 + $0x48] sm:$0xff] %v173_v30  ;;  %v176_v39 = vadd.f32 %v114_v37, %v52_v36  ;;  %v115_v40 = vld [vmem:[#allocation5 + $0x68] sm:$0xff]  ;;  %v54_v41 = vld [vmem:[#allocation2 + $0x70] sm:$0xff]  ;;  %v116_v42 = vld [vmem:[#allocation5 + $0x70] sm:$0xff] }
  0x31   :  { %236 = vst [vmem:[#allocation7 + $0x50] sm:$0xff] %v174_v34  ;;  %237 = vst [vmem:[#allocation7 + $0x58] sm:$0xff] %v175_v35  ;;  %v177_v43 = vadd.f32 %v115_v40, %v53_v38  ;;  %v178_v44 = vadd.f32 %v116_v42, %v54_v41  ;;  %v55_v45 = vld [vmem:[#allocation2 + $0x78] sm:$0xff]  ;;  %v117_v46 = vld [vmem:[#allocation5 + $0x78] sm:$0xff] }
  0x32   :  { %v56_v47 = vld [vmem:[#allocation2 + $0x80] sm:$0xff]  ;;  %238 = vst [vmem:[#allocation7 + $0x60] sm:$0xff] %v176_v39  ;;  %v179_v48 = vadd.f32 %v117_v46, %v55_v45  ;;  %v118_v49 = vld [vmem:[#allocation5 + $0x80] sm:$0xff]  ;;  %v57_v50 = vld [vmem:[#allocation2 + $0x88] sm:$0xff] }
  0x33   :  { %v119_v51 = vld [vmem:[#allocation5 + $0x88] sm:$0xff]  ;;  %239 = vst [vmem:[#allocation7 + $0x68] sm:$0xff] %v177_v43  ;;  %240 = vst [vmem:[#allocation7 + $0x70] sm:$0xff] %v178_v44  ;;  %v180_v52 = vadd.f32 %v118_v49, %v56_v47  ;;  %v58_v54 = vld [vmem:[#allocation2 + $0x90] sm:$0xff] }
  0x34   :  { %v181_v53 = vadd.f32 %v119_v51, %v57_v50  ;;  %v120_v55 = vld [vmem:[#allocation5 + $0x90] sm:$0xff]  ;;  %v59_v56 = vld [vmem:[#allocation2 + $0x98] sm:$0xff]  ;;  %241 = vst [vmem:[#allocation7 + $0x78] sm:$0xff] %v179_v48  ;;  %v121_v58 = vld [vmem:[#allocation5 + $0x98] sm:$0xff] }
  0x35   :  { %v182_v57 = vadd.f32 %v120_v55, %v58_v54  ;;  %v60_v59 = vld [vmem:[#allocation2 + $0xa0] sm:$0xff]  ;;  %v122_v60 = vld [vmem:[#allocation5 + $0xa0] sm:$0xff]  ;;  %242 = vst [vmem:[#allocation7 + $0x80] sm:$0xff] %v180_v52  ;;  %v183_v61 = vadd.f32 %v121_v58, %v59_v56  ;;  %v61_v63 = vld [vmem:[#allocation2 + $0xa8] sm:$0xff] }
  0x36   :  { %243 = vst [vmem:[#allocation7 + $0x88] sm:$0xff] %v181_v53  ;;  %v184_v62 = vadd.f32 %v122_v60, %v60_v59  ;;  %v123_v0 = vld [vmem:[#allocation5 + $0xa8] sm:$0xff]  ;;  %v62_v1 = vld [vmem:[#allocation2 + $0xb0] sm:$0xff]  ;;  %v124_v3 = vld [vmem:[#allocation5 + $0xb0] sm:$0xff] }
  0x37   :  { %244 = vst [vmem:[#allocation7 + $0x90] sm:$0xff] %v182_v57  ;;  %v185_v2 = vadd.f32 %v123_v0, %v61_v63  ;;  %v63_v4 = vld [vmem:[#allocation2 + $0xb8] sm:$0xff]  ;;  %v125_v5 = vld [vmem:[#allocation5 + $0xb8] sm:$0xff]  ;;  %245 = vst [vmem:[#allocation7 + $0x98] sm:$0xff] %v183_v61  ;;  %v186_v6 = vadd.f32 %v124_v3, %v62_v1 }
  0x38   :  { %246 = vst [vmem:[#allocation7 + $0xa0] sm:$0xff] %v184_v62  ;;  %v187_v7 = vadd.f32 %v125_v5, %v63_v4  ;;  %v64_v8 = vld [vmem:[#allocation2 + $0xc0] sm:$0xff]  ;;  %v126_v9 = vld [vmem:[#allocation5 + $0xc0] sm:$0xff]  ;;  %v65_v10 = vld [vmem:[#allocation2 + $0xc8] sm:$0xff] }
  0x39   :  { %247 = vst [vmem:[#allocation7 + $0xa8] sm:$0xff] %v185_v2  ;;  %v188_v11 = vadd.f32 %v126_v9, %v64_v8  ;;  %v127_v12 = vld [vmem:[#allocation5 + $0xc8] sm:$0xff]  ;;  %v66_v13 = vld [vmem:[#allocation2 + $0xd0] sm:$0xff]  ;;  %v128_v14 = vld [vmem:[#allocation5 + $0xd0] sm:$0xff] }
  0x3a   :  { %248 = vst [vmem:[#allocation7 + $0xb0] sm:$0xff] %v186_v6  ;;  %249 = vst [vmem:[#allocation7 + $0xb8] sm:$0xff] %v187_v7  ;;  %v189_v15 = vadd.f32 %v127_v12, %v65_v10  ;;  %v190_v16 = vadd.f32 %v128_v14, %v66_v13  ;;  %v67_v17 = vld [vmem:[#allocation2 + $0xd8] sm:$0xff]  ;;  %v129_v18 = vld [vmem:[#allocation5 + $0xd8] sm:$0xff] }
  0x3b   :  { %v68_v19 = vld [vmem:[#allocation2 + $0xe0] sm:$0xff]  ;;  %250 = vst [vmem:[#allocation7 + $0xc0] sm:$0xff] %v188_v11  ;;  %v191_v20 = vadd.f32 %v129_v18, %v67_v17  ;;  %v130_v21 = vld [vmem:[#allocation5 + $0xe0] sm:$0xff]  ;;  %v69_v22 = vld [vmem:[#allocation2 + $0xe8] sm:$0xff] }
  0x3c   :  { %v131_v23 = vld [vmem:[#allocation5 + $0xe8] sm:$0xff]  ;;  %251 = vst [vmem:[#allocation7 + $0xc8] sm:$0xff] %v189_v15  ;;  %252 = vst [vmem:[#allocation7 + $0xd0] sm:$0xff] %v190_v16  ;;  %v192_v24 = vadd.f32 %v130_v21, %v68_v19  ;;  %v70_v26 = vld [vmem:[#allocation2 + $0xf0] sm:$0xff] }
  0x3d   :  { %v193_v25 = vadd.f32 %v131_v23, %v69_v22  ;;  %v132_v27 = vld [vmem:[#allocation5 + $0xf0] sm:$0xff]  ;;  %v71_v28 = vld [vmem:[#allocation2 + $0xf8] sm:$0xff]  ;;  %253 = vst [vmem:[#allocation7 + $0xd8] sm:$0xff] %v191_v20  ;;  %v133_v30 = vld [vmem:[#allocation5 + $0xf8] sm:$0xff] }
  0x3e   :  { %v194_v29 = vadd.f32 %v132_v27, %v70_v26  ;;  %v72_v31 = vld [vmem:[#allocation2 + $0x100] sm:$0xff]  ;;  %v134_v32 = vld [vmem:[#allocation5 + $0x100] sm:$0xff]  ;;  %254 = vst [vmem:[#allocation7 + $0xe0] sm:$0xff] %v192_v24  ;;  %v195_v33 = vadd.f32 %v133_v30, %v71_v28  ;;  %v73_v35 = vld [vmem:[#allocation2 + $0x108] sm:$0xff] }
  0x3f   :  { %255 = vst [vmem:[#allocation7 + $0xe8] sm:$0xff] %v193_v25  ;;  %v196_v34 = vadd.f32 %v134_v32, %v72_v31  ;;  %v135_v36 = vld [vmem:[#allocation5 + $0x108] sm:$0xff]  ;;  %v74_v37 = vld [vmem:[#allocation2 + $0x110] sm:$0xff]  ;;  %v136_v39 = vld [vmem:[#allocation5 + $0x110] sm:$0xff] }
  0x40   :  { %256 = vst [vmem:[#allocation7 + $0xf0] sm:$0xff] %v194_v29  ;;  %v197_v38 = vadd.f32 %v135_v36, %v73_v35  ;;  %v75_v40 = vld [vmem:[#allocation2 + $0x118] sm:$0xff]  ;;  %v137_v41 = vld [vmem:[#allocation5 + $0x118] sm:$0xff]  ;;  %257 = vst [vmem:[#allocation7 + $0xf8] sm:$0xff] %v195_v33  ;;  %v198_v42 = vadd.f32 %v136_v39, %v74_v37 }
  0x41   :  { %258 = vst [vmem:[#allocation7 + $0x100] sm:$0xff] %v196_v34  ;;  %v199_v43 = vadd.f32 %v137_v41, %v75_v40  ;;  %v76_v44 = vld [vmem:[#allocation2 + $0x120] sm:$0xff]  ;;  %v138_v45 = vld [vmem:[#allocation5 + $0x120] sm:$0xff]  ;;  %v77_v46 = vld [vmem:[#allocation2 + $0x128] sm:$0xff] }
  0x42   :  { %259 = vst [vmem:[#allocation7 + $0x108] sm:$0xff] %v197_v38  ;;  %v200_v47 = vadd.f32 %v138_v45, %v76_v44  ;;  %v139_v48 = vld [vmem:[#allocation5 + $0x128] sm:$0xff]  ;;  %v78_v49 = vld [vmem:[#allocation2 + $0x130] sm:$0xff]  ;;  %v140_v50 = vld [vmem:[#allocation5 + $0x130] sm:$0xff] }
  0x43   :  { %260 = vst [vmem:[#allocation7 + $0x110] sm:$0xff] %v198_v42  ;;  %261 = vst [vmem:[#allocation7 + $0x118] sm:$0xff] %v199_v43  ;;  %v201_v51 = vadd.f32 %v139_v48, %v77_v46  ;;  %v202_v52 = vadd.f32 %v140_v50, %v78_v49  ;;  %v79_v53 = vld [vmem:[#allocation2 + $0x138] sm:$0xff]  ;;  %v141_v54 = vld [vmem:[#allocation5 + $0x138] sm:$0xff] }
  0x44   :  { %v80_v55 = vld [vmem:[#allocation2 + $0x140] sm:$0xff]  ;;  %262 = vst [vmem:[#allocation7 + $0x120] sm:$0xff] %v200_v47  ;;  %v203_v56 = vadd.f32 %v141_v54, %v79_v53  ;;  %v142_v57 = vld [vmem:[#allocation5 + $0x140] sm:$0xff]  ;;  %v81_v58 = vld [vmem:[#allocation2 + $0x148] sm:$0xff] }
  0x45   :  { %v143_v59 = vld [vmem:[#allocation5 + $0x148] sm:$0xff]  ;;  %263 = vst [vmem:[#allocation7 + $0x128] sm:$0xff] %v201_v51  ;;  %264 = vst [vmem:[#allocation7 + $0x130] sm:$0xff] %v202_v52  ;;  %v204_v60 = vadd.f32 %v142_v57, %v80_v55  ;;  %v82_v62 = vld [vmem:[#allocation2 + $0x150] sm:$0xff] }
  0x46   :  { %v205_v61 = vadd.f32 %v143_v59, %v81_v58  ;;  %v144_v63 = vld [vmem:[#allocation5 + $0x150] sm:$0xff]  ;;  %v83_v0 = vld [vmem:[#allocation2 + $0x158] sm:$0xff]  ;;  %265 = vst [vmem:[#allocation7 + $0x138] sm:$0xff] %v203_v56  ;;  %v145_v2 = vld [vmem:[#allocation5 + $0x158] sm:$0xff] }
  0x47   :  { %v206_v1 = vadd.f32 %v144_v63, %v82_v62  ;;  %v84_v3 = vld [vmem:[#allocation2 + $0x160] sm:$0xff]  ;;  %v146_v4 = vld [vmem:[#allocation5 + $0x160] sm:$0xff]  ;;  %266 = vst [vmem:[#allocation7 + $0x140] sm:$0xff] %v204_v60  ;;  %v207_v5 = vadd.f32 %v145_v2, %v83_v0  ;;  %v85_v7 = vld [vmem:[#allocation2 + $0x168] sm:$0xff] }
  0x48   :  { %267 = vst [vmem:[#allocation7 + $0x148] sm:$0xff] %v205_v61  ;;  %v208_v6 = vadd.f32 %v146_v4, %v84_v3  ;;  %v147_v8 = vld [vmem:[#allocation5 + $0x168] sm:$0xff]  ;;  %v86_v9 = vld [vmem:[#allocation2 + $0x170] sm:$0xff]  ;;  %v148_v11 = vld [vmem:[#allocation5 + $0x170] sm:$0xff] }
  0x49   :  { %268 = vst [vmem:[#allocation7 + $0x150] sm:$0xff] %v206_v1  ;;  %v209_v10 = vadd.f32 %v147_v8, %v85_v7  ;;  %v87_v12 = vld [vmem:[#allocation2 + $0x178] sm:$0xff]  ;;  %v149_v13 = vld [vmem:[#allocation5 + $0x178] sm:$0xff]  ;;  %269 = vst [vmem:[#allocation7 + $0x158] sm:$0xff] %v207_v5  ;;  %v210_v14 = vadd.f32 %v148_v11, %v86_v9 }
  0x4a   :  { %270 = vst [vmem:[#allocation7 + $0x160] sm:$0xff] %v208_v6  ;;  %v211_v15 = vadd.f32 %v149_v13, %v87_v12  ;;  %v88_v16 = vld [vmem:[#allocation2 + $0x180] sm:$0xff]  ;;  %v150_v17 = vld [vmem:[#allocation5 + $0x180] sm:$0xff]  ;;  %v89_v18 = vld [vmem:[#allocation2 + $0x188] sm:$0xff] }
  0x4b   :  { %271 = vst [vmem:[#allocation7 + $0x168] sm:$0xff] %v209_v10  ;;  %v212_v19 = vadd.f32 %v150_v17, %v88_v16  ;;  %v151_v20 = vld [vmem:[#allocation5 + $0x188] sm:$0xff]  ;;  %v90_v21 = vld [vmem:[#allocation2 + $0x190] sm:$0xff]  ;;  %v152_v22 = vld [vmem:[#allocation5 + $0x190] sm:$0xff] }
  0x4c   :  { %272 = vst [vmem:[#allocation7 + $0x170] sm:$0xff] %v210_v14  ;;  %273 = vst [vmem:[#allocation7 + $0x178] sm:$0xff] %v211_v15  ;;  %v213_v23 = vadd.f32 %v151_v20, %v89_v18  ;;  %v214_v24 = vadd.f32 %v152_v22, %v90_v21  ;;  %v91_v25 = vld [vmem:[#allocation2 + $0x198] sm:$0xff]  ;;  %v153_v26 = vld [vmem:[#allocation5 + $0x198] sm:$0xff] }
  0x4d   :  { %v92_v27 = vld [vmem:[#allocation2 + $0x1a0] sm:$0xff]  ;;  %274 = vst [vmem:[#allocation7 + $0x180] sm:$0xff] %v212_v19  ;;  %v215_v28 = vadd.f32 %v153_v26, %v91_v25  ;;  %v154_v29 = vld [vmem:[#allocation5 + $0x1a0] sm:$0xff]  ;;  %v93_v30 = vld [vmem:[#allocation2 + $0x1a8] sm:$0xff] }
  0x4e   :  { %v155_v31 = vld [vmem:[#allocation5 + $0x1a8] sm:$0xff]  ;;  %275 = vst [vmem:[#allocation7 + $0x188] sm:$0xff] %v213_v23  ;;  %276 = vst [vmem:[#allocation7 + $0x190] sm:$0xff] %v214_v24  ;;  %v216_v32 = vadd.f32 %v154_v29, %v92_v27  ;;  %v94_v34 = vld [vmem:[#allocation2 + $0x1b0] sm:$0xff] }
  0x4f   :  { %v217_v33 = vadd.f32 %v155_v31, %v93_v30  ;;  %v156_v35 = vld [vmem:[#allocation5 + $0x1b0] sm:$0xff]  ;;  %v95_v36 = vld [vmem:[#allocation2 + $0x1b8] sm:$0xff]  ;;  %277 = vst [vmem:[#allocation7 + $0x198] sm:$0xff] %v215_v28  ;;  %v157_v38 = vld [vmem:[#allocation5 + $0x1b8] sm:$0xff] }
  0x50   :  { %v218_v37 = vadd.f32 %v156_v35, %v94_v34  ;;  %v96_v39 = vld [vmem:[#allocation2 + $0x1c0] sm:$0xff]  ;;  %v158_v40 = vld [vmem:[#allocation5 + $0x1c0] sm:$0xff]  ;;  %278 = vst [vmem:[#allocation7 + $0x1a0] sm:$0xff] %v216_v32  ;;  %v219_v41 = vadd.f32 %v157_v38, %v95_v36  ;;  %v97_v43 = vld [vmem:[#allocation2 + $0x1c8] sm:$0xff] }
  0x51   :  { %279 = vst [vmem:[#allocation7 + $0x1a8] sm:$0xff] %v217_v33  ;;  %v220_v42 = vadd.f32 %v158_v40, %v96_v39  ;;  %v159_v44 = vld [vmem:[#allocation5 + $0x1c8] sm:$0xff]  ;;  %v98_v45 = vld [vmem:[#allocation2 + $0x1d0] sm:$0xff]  ;;  %v160_v47 = vld [vmem:[#allocation5 + $0x1d0] sm:$0xff] }
  0x52   :  { %280 = vst [vmem:[#allocation7 + $0x1b0] sm:$0xff] %v218_v37  ;;  %v221_v46 = vadd.f32 %v159_v44, %v97_v43  ;;  %v99_v48 = vld [vmem:[#allocation2 + $0x1d8] sm:$0xff]  ;;  %v161_v49 = vld [vmem:[#allocation5 + $0x1d8] sm:$0xff]  ;;  %281 = vst [vmem:[#allocation7 + $0x1b8] sm:$0xff] %v219_v41  ;;  %v222_v50 = vadd.f32 %v160_v47, %v98_v45 }
  0x53   :  { %282 = vst [vmem:[#allocation7 + $0x1c0] sm:$0xff] %v220_v42  ;;  %v223_v51 = vadd.f32 %v161_v49, %v99_v48  ;;  %v100_v52 = vld [vmem:[#allocation2 + $0x1e0] sm:$0x1f]  ;;  %v162_v53 = vld [vmem:[#allocation5 + $0x1e0] sm:$0x1f] }
  0x54   :  { %v101_v54 = vld [vmem:[#allocation2 + $0x1e8] sm:$0x1f]  ;;  %283 = vst [vmem:[#allocation7 + $0x1c8] sm:$0xff] %v221_v46  ;;  %v224_v55 = vadd.f32 %v162_v53, %v100_v52  ;;  %v163_v56 = vld [vmem:[#allocation5 + $0x1e8] sm:$0x1f]  ;;  %284 = vst [vmem:[#allocation7 + $0x1d0] sm:$0xff] %v222_v50 }
  0x55   :  { %285 = vst [vmem:[#allocation7 + $0x1d8] sm:$0xff] %v223_v51  ;;  %v225_v57 = vadd.f32 %v163_v56, %v101_v54 }
  0x56   :  { %286 = vst [vmem:[#allocation7 + $0x1e0] sm:$0x1f] %v224_v55 }
  0x57   :  { %287 = vst [vmem:[#allocation7 + $0x1e8] sm:$0x1f] %v225_v57 }
  0x58   :  { %366 = shalt.err (!%p363_p6)
}
  0x59   :  { %s367_s10 = scalar_lea.hbm %s450_s2, 7936 }
  0x5a   :  { %p368_p7 = scmp.ne.s32.totalorder %s450_s2, %s367_s10  ;;  %p371_p8 = scmp.lt.u32.totalorder %s367_s10, %s450_s2 }
  0x5c   :  { %p373_p9 = pnand %p371_p8, %p368_p7 }
  0x5e   :  { %376 = shalt.err (!%p373_p9)
}
  0x5f   :  { %299 = dma.vmem_to_hbm [thread:$0]  %s294_s6, 7936, %s450_s2, [#allocation4], %s384_s19, %s384_s19, %s385_s20  }
  0x60   :  { %381 = dma.done.wait [#allocation4], 7936  }
  0x61   :  { %382 = vsyncadd [#allocation4], 4294959360 }
  0x62   :  { %303 = vsyncpa [#allocation3], 1 }
  0x63   :  { %304 = vsyncpa [#allocation6], 1 }
  0x64   :  { %305 = vsyncpa [#allocation4], 1 }

</bundles_post_ra>
